<compile_context>
chip_gen: v5e
topology: v5e:2x2
jax: 0.10.0
libtpu: 0.0.40
codegen_flags: <defaults>
</compile_context>

<pallas_src>
import jax
import jax.numpy as jnp
from jax import lax
from jax.experimental import pallas as pl
from jax.experimental.pallas import tpu as pltpu


def _weighted_doc_kernel(ids_ref, w_ref, tbl_ref, o_ref, emb_ref):
    # ids_ref: (B_pad, S) int32, SMEM (scalar-prefetched document token ids)
    # w_ref:   (TB, S, 1) f32   raw per-token weights for this batch block
    # tbl_ref: (V, E)           embedding table, resident in VMEM (fetched once)
    # o_ref:   (TB, 1, E) f32   encoded document vectors for this batch block
    # emb_ref: (TB, S, E)       VMEM scratch holding the gathered embedding rows
    blk = pl.program_id(0)
    TB, S, _ = emb_ref.shape

    # --- fused gather: VMEM-resident table -> VMEM scratch (no HBM round-trip)
    def gather_s(s, carry):
        for b in range(TB):  # static unroll over the rows of this batch block
            tok = ids_ref[blk * TB + b, s]                       # SMEM scalar read
            emb_ref[b, pl.ds(s, 1), :] = tbl_ref[pl.ds(tok, 1), :]
        return carry

    lax.fori_loop(0, S, gather_s, 0)

    # --- numerically stable softmax over the sequence axis (axis=1, sublanes)
    w = w_ref[...].astype(jnp.float32)                           # (TB, S, 1)
    m = jnp.max(w, axis=1, keepdims=True)                        # (TB, 1, 1)
    ew = jnp.exp(w - m)                                          # EUP
    denom = jnp.sum(ew, axis=1, keepdims=True)                   # (TB, 1, 1)
    p = ew * pl.reciprocal(denom, approx=True)                   # EUP reciprocal

    # --- weighted reduce on the VPU/XLU (lane-broadcast multiply + sublane sum)
    e = emb_ref[...].astype(jnp.float32)                         # (TB, S, E)
    o_ref[...] = jnp.sum(p * e, axis=1, keepdims=True).astype(o_ref.dtype)


def document_encoder_forward(document, lens, token_embed_table, weight_table,
                             *, block_b=8):
    """Pallas implementation of DocumentEncoder._weighted_forward (eval mode).

    document:          (B, S) int token ids
    lens:              (B,)   int (unused by the weighted path; API parity)
    token_embed_table: (V, E) embedding weights (any float dtype, fed natively)
    weight_table:      (V, 1) per-token scalar weight embedding
    returns:           (B, E) float32
    """
    del lens  # the PyTorch _weighted_forward branch ignores lens as well
    B, S = document.shape
    V, E = token_embed_table.shape

    # Batch-block size. For production shapes pick TB so TB*S*E*itemsize is
    # ~1-4 MiB, keep >= 2 grid steps on v7x (2 TensorCores / 64 MiB VMEM), and
    # make sure the resident (V, E) table + scratch stays within scoped VMEM.
    tb = max(1, min(block_b, B))
    b_pad = ((B + tb - 1) // tb) * tb

    ids = document.astype(jnp.int32)
    if b_pad != B:
        ids = jnp.pad(ids, ((0, b_pad - B), (0, 0)))  # pad with id 0 (valid row)

    # Tiny (B, S, 1) weight gather stays in the wrapper: it moves only B*S*4
    # bytes, negligible next to the fused (B, S, E) embedding gather.
    w3 = weight_table[ids].astype(jnp.float32)                   # (b_pad, S, 1)

    grid = (b_pad // tb,)
    out = pl.pallas_call(
        _weighted_doc_kernel,
        out_shape=jax.ShapeDtypeStruct((b_pad, 1, E), jnp.float32),
        grid_spec=pltpu.PrefetchScalarGridSpec(
            num_scalar_prefetch=1,                 # document ids -> SMEM
            grid=grid,
            in_specs=[
                # raw per-token weights for the TB rows of this grid step
                pl.BlockSpec((tb, S, 1), lambda i, ids_ref: (i, 0, 0)),
                # full embedding table; constant block index -> DMA'd once,
                # then stays resident in VMEM for every grid step
                pl.BlockSpec((V, E), lambda i, ids_ref: (0, 0)),
            ],
            out_specs=pl.BlockSpec((tb, 1, E), lambda i, ids_ref: (i, 0, 0)),
            scratch_shapes=[
                pltpu.VMEM((tb, S, E), token_embed_table.dtype),  # gathered rows
            ],
        ),
        compiler_params=pltpu.CompilerParams(
            dimension_semantics=("parallel",)),
    )(ids, w3, token_embed_table)
    return out[:B, 0, :]                                          # (B, E)


def _reference_forward(document, token_embed_table, weight_table):
    doc_tokens = token_embed_table[document]                      # (B, S, E)
    token_weights = weight_table[document][..., 0]                # (B, S)
    p = jax.nn.softmax(token_weights, axis=1)
    return jnp.sum(p[..., None] * doc_tokens.astype(jnp.float32), axis=1)


if __name__ == "__main__":
    # Small, module-consistent shapes.
    B, S = 2, 8          # batch, document sequence length
    V, E = 64, 32        # vocab size, word embed size

    key = jax.random.PRNGKey(0)
    k_emb, k_w, k_doc, k_len = jax.random.split(key, 4)

    # document_token_embeds.weight : (V, E)
    token_embed_table = jax.random.normal(k_emb, (V, E), dtype=jnp.float32)
    # self.weights (CustomEmbedding(V, 1)) with xavier_normal init: std = sqrt(2/(V+1))
    xavier_std = (2.0 / (V + 1)) ** 0.5
    weight_table = xavier_std * jax.random.normal(k_w, (V, 1), dtype=jnp.float32)

    document = jax.random.randint(k_doc, (B, S), 0, V, dtype=jnp.int32)
    lens = jnp.full((B,), S, dtype=jnp.int32)

    out = document_encoder_forward(document, lens, token_embed_table, weight_table)
    out = jax.block_until_ready(out)

    ref = _reference_forward(document, token_embed_table, weight_table)
    assert out.shape == (B, E)
    # Tolerance accounts for the approximate EUP reciprocal (~1e-4 relative)
    # used for the softmax denominator inside the kernel.
    assert jnp.allclose(out, ref, atol=2e-3, rtol=2e-3), "mismatch vs JAX reference"

    print("KERNEL_OK")
</pallas_src>

<mosaic_0001>
module attributes {stable_mosaic.version = 11 : i64} {
  func.func @_weighted_doc_kernel(%arg0: i32, %arg1: memref<2x8xi32, #tpu.memory_space<smem>>, %arg2: memref<2x8x1xf32, #tpu.memory_space<vmem>>, %arg3: memref<64x32xf32, #tpu.memory_space<vmem>>, %arg4: memref<2x1x32xf32, #tpu.memory_space<vmem>>, %arg5: memref<2x8x32xf32, #tpu.memory_space<vmem>>) attributes {dimension_semantics = [#tpu.dimension_semantics<parallel>], iteration_bounds = array<i64: 1>, scalar_prefetch = 1 : i64, scratch_operands = 1 : i64, tpu.core_type = #tpu.core_type<tc>, window_params = [{transform_indices = @transform_0, window_bounds = array<i64: 2, 8, 1>}, {pipeline_mode = #tpu.pipeline_mode<synchronous>, transform_indices = @transform_1, window_bounds = array<i64: 64, 32>}, {transform_indices = @transform_2, window_bounds = array<i64: 2, 1, 32>}]} {
    %c0_i32 = arith.constant 0 : i32
    %c8_i32 = arith.constant 8 : i32
    %0 = arith.addi %c0_i32, %c8_i32 : i32
    %c1_i32 = arith.constant 1 : i32
    scf.for %arg6 = %c0_i32 to %0 step %c1_i32  : i32 {
      %c2_i32 = arith.constant 2 : i32
      %18 = arith.muli %arg0, %c2_i32 : i32
      %c0_i32_11 = arith.constant 0 : i32
      %19 = arith.addi %18, %c0_i32_11 : i32
      %20 = arith.index_cast %19 : i32 to index
      %21 = arith.index_cast %arg6 : i32 to index
      %22 = memref.load %arg1[%20, %21] : memref<2x8xi32, #tpu.memory_space<smem>>
      %23 = arith.index_cast %22 : i32 to index
      %c0_12 = arith.constant 0 : index
      %24 = vector.load %arg3[%23, %c0_12] : memref<64x32xf32, #tpu.memory_space<vmem>>, vector<1x32xf32>
      %c0_13 = arith.constant 0 : index
      %25 = arith.index_cast %arg6 : i32 to index
      %c0_14 = arith.constant 0 : index
      %26 = vector.load %arg5[%c0_13, %25, %c0_14] : memref<2x8x32xf32, #tpu.memory_space<vmem>>, vector<1x1x32xf32>
      %27 = vector.shape_cast %26 : vector<1x1x32xf32> to vector<1x32xf32>
      %28 = vector.shape_cast %24 : vector<1x32xf32> to vector<1x1x32xf32>
      tpu.vector_store %arg5[%c0_13, %25, %c0_14], %28 {strides = array<i32>} : memref<2x8x32xf32, #tpu.memory_space<vmem>>, vector<1x1x32xf32>,
      %c2_i32_15 = arith.constant 2 : i32
      %29 = arith.muli %arg0, %c2_i32_15 : i32
      %c1_i32_16 = arith.constant 1 : i32
      %30 = arith.addi %29, %c1_i32_16 : i32
      %31 = arith.index_cast %30 : i32 to index
      %32 = arith.index_cast %arg6 : i32 to index
      %33 = memref.load %arg1[%31, %32] : memref<2x8xi32, #tpu.memory_space<smem>>
      %34 = arith.index_cast %33 : i32 to index
      %c0_17 = arith.constant 0 : index
      %35 = vector.load %arg3[%34, %c0_17] : memref<64x32xf32, #tpu.memory_space<vmem>>, vector<1x32xf32>
      %c1 = arith.constant 1 : index
      %36 = arith.index_cast %arg6 : i32 to index
      %c0_18 = arith.constant 0 : index
      %37 = vector.load %arg5[%c1, %36, %c0_18] : memref<2x8x32xf32, #tpu.memory_space<vmem>>, vector<1x1x32xf32>
      %38 = vector.shape_cast %37 : vector<1x1x32xf32> to vector<1x32xf32>
      %39 = vector.shape_cast %35 : vector<1x32xf32> to vector<1x1x32xf32>
      tpu.vector_store %arg5[%c1, %36, %c0_18], %39 {strides = array<i32>} : memref<2x8x32xf32, #tpu.memory_space<vmem>>, vector<1x1x32xf32>,
    }
    %c8_i32_0 = arith.constant 8 : i32
    %c0 = arith.constant 0 : index
    %c0_1 = arith.constant 0 : index
    %c0_2 = arith.constant 0 : index
    %1 = vector.load %arg2[%c0, %c0_1, %c0_2] : memref<2x8x1xf32, #tpu.memory_space<vmem>>, vector<2x8x1xf32>
    %cst = arith.constant dense<0xFF800000> : vector<2x1xf32>
    %2 = vector.multi_reduction <maximumf>, %1, %cst [1] : vector<2x8x1xf32> to vector<2x1xf32>
    %3 = vector.shape_cast %2 : vector<2x1xf32> to vector<2x1x1xf32>
    %4 = vector.broadcast %3 : vector<2x1x1xf32> to vector<2x8x1xf32>
    %5 = arith.subf %1, %4 : vector<2x8x1xf32>
    %6 = math.exp %5 : vector<2x8x1xf32>
    %cst_3 = arith.constant dense<0.000000e+00> : vector<2x1xf32>
    %7 = vector.multi_reduction <add>, %6, %cst_3 [1] : vector<2x8x1xf32> to vector<2x1xf32>
    %8 = vector.shape_cast %7 : vector<2x1xf32> to vector<2x1x1xf32>
    %9 = tpu.reciprocal %8 {approx = true} : vector<2x1x1xf32> -> vector<2x1x1xf32>
    %10 = vector.broadcast %9 : vector<2x1x1xf32> to vector<2x8x1xf32>
    %11 = arith.mulf %6, %10 : vector<2x8x1xf32>
    %c0_4 = arith.constant 0 : index
    %c0_5 = arith.constant 0 : index
    %c0_6 = arith.constant 0 : index
    %12 = vector.load %arg5[%c0_4, %c0_5, %c0_6] : memref<2x8x32xf32, #tpu.memory_space<vmem>>, vector<2x8x32xf32>
    %13 = vector.broadcast %11 : vector<2x8x1xf32> to vector<2x8x32xf32>
    %14 = arith.mulf %13, %12 : vector<2x8x32xf32>
    %cst_7 = arith.constant dense<0.000000e+00> : vector<2x32xf32>
    %15 = vector.multi_reduction <add>, %14, %cst_7 [1] : vector<2x8x32xf32> to vector<2x32xf32>
    %16 = vector.shape_cast %15 : vector<2x32xf32> to vector<2x1x32xf32>
    %c0_8 = arith.constant 0 : index
    %c0_9 = arith.constant 0 : index
    %c0_10 = arith.constant 0 : index
    %17 = vector.load %arg4[%c0_8, %c0_9, %c0_10] : memref<2x1x32xf32, #tpu.memory_space<vmem>>, vector<2x1x32xf32>
    tpu.vector_store %arg4[%c0_8, %c0_9, %c0_10], %16 {strides = array<i32>} : memref<2x1x32xf32, #tpu.memory_space<vmem>>, vector<2x1x32xf32>,
    return
  }
  func.func @transform_0(%arg0: i32, %arg1: memref<2x8xi32, #tpu.memory_space<smem>>) -> (i32, i32, i32) {
    %c0_i32 = arith.constant 0 : i32
    %c0_i32_0 = arith.constant 0 : i32
    %c0_i32_1 = arith.constant 0 : i32
    return %arg0, %c0_i32, %c0_i32_0 : i32, i32, i32
  }
  func.func @transform_1(%arg0: i32, %arg1: memref<2x8xi32, #tpu.memory_space<smem>>) -> (i32, i32) {
    %c0_i32 = arith.constant 0 : i32
    %c0_i32_0 = arith.constant 0 : i32
    %c0_i32_1 = arith.constant 0 : i32
    return %c0_i32, %c0_i32_0 : i32, i32
  }
  func.func @transform_2(%arg0: i32, %arg1: memref<2x8xi32, #tpu.memory_space<smem>>) -> (i32, i32, i32) {
    %c0_i32 = arith.constant 0 : i32
    %c0_i32_0 = arith.constant 0 : i32
    %c0_i32_1 = arith.constant 0 : i32
    return %arg0, %c0_i32, %c0_i32_0 : i32, i32, i32
  }
}

</mosaic_0001>

<bundles_post_ra>
// kernel: tpu_custom_call.1
= control target key start
LH: loop header
LB: loop body
LE: loop exit
PB: predicated region body
PF: predicated region fallthrough
CT: control target
= control target key end

     0   :  { %s227_s15 = smov [#allocation4]   ;;  %s278_s0 = inlined_call_operand.vmem [shape: s32[2,8], index: 0, kind: input, shape index: {}]   ;;  %s279_s1 = inlined_call_operand.vmem [shape: f32[2,8,1], index: 1, kind: input, shape index: {}]   ;;  %s280_s2 = inlined_call_operand.vmem [shape: f32[64,32], index: 2, kind: input, shape index: {}]   ;;  %s281_s3 = inlined_call_operand.hbm [shape: f32[2,1,32], index: 3, kind: output, shape index: {}]  }
   0x1   :  { %s9_s14 = sshll.u32 %s278_s0, 4  ;;  %s10_s14 = int_to_ptr.vmem [resolvable:$true] %s9_s14 }
   0x2   :  { %12 = dma.vmem_to_smem %s10_s14, 32, %s227_s15, [#allocation3] }
   0x3   :  { %219 = dma.done.wait [#allocation3], 32 }
   0x4   :  { %220 = vsyncadd [#allocation3], 4294967264 }
   0x5   :  { %15 = sfence }
   0x6   :  { %16 = vsyncpa [#allocation6], 0  ;;  %s223_s16 = smov 0  }
   0x7 LB: > { %s28_s17 = sshra.s32 %s225_s16, 7  ;;  %s33_s18 = sand.u32 127, %s225_s16  ;;  %vm39_vm0 = vcmask 253952   ;;  %s225_s16 = sphi %s223_s16, %s26_s16  }
   0x8   : > { %s152_s19 = sshll.u32 %s28_s17, 7  ;;  %s38_s30 = scalar_lea.vmem [#allocation2], %s225_s16 }
   0x9   : > { %s34_s20 = sadd.s32 %s152_s19, %s33_s18  ;;  %s156_s21 = sadd.s32 128, %s152_s19 }
   0xa   : > { %s35_s22 = sld [smem:[#allocation4 + %s34_s20]]  ;;  %s44_s23 = sadd.s32 %s156_s21, %s33_s18 }
   0xb   : > { %s45_s24 = sld [smem:[#allocation4 + %s44_s23]]  ;;  %s26_s16 = sadd.s32 1, %s225_s16  }
   0xc   : > { %p23_p0 = scmp.ge.s32.totalorder %s26_s16, 8  }
   0xd   :  { %v51_v2 = vld [vmem:[%s279_s1] sm:$0xff] (%p23_p0)  ;;  %vm53_vm1 = vcmask (%p23_p0), 7168   ;;  %v52_v3 = vld [vmem:[%s279_s1 + $0x8] sm:$0xff] (%p23_p0)  ;;  %v228_v4 = vmov (%p23_p0), 0   ;;  %vm106_vm2 = vcmask (%p23_p0), 261120   ;;  %s229_s1 = smov (%p23_p0), [#allocation5]  }
   0xe   :  { %170 = vset.pattern.permute.xlu0 (%p23_p0), %v228_v4  ;;  %v54_v5 = vsel (%p23_p0), %vm53_vm1, %v51_v2, -inf  ;;  %v61_v6 = vsel (%p23_p0), %vm53_vm1, %v52_v3, -inf  ;;  %s130_s10 = sshll.u32 (%p23_p0), %s281_s3, 4  ;;  %s230_s11 = smov (%p23_p0), 16   ;;  %s131_s10 = int_to_ptr.hbm [resolvable:$true] %s130_s10 }
   0xf   :  { %25 = sbr.rel (!%p23_p0) target bundleno = 7 (0x7), region = 39  ;;  %v55_v7 = vrot.slane (%p23_p0), %v54_v5, 4  ;;  %v62_v8 = vrot.slane (%p23_p0), %v61_v6, 4  ;;  %s231_s12 = smov (%p23_p0), 1  }
  0x10   : > { %s36_s26 = scalar_lea.vmem %s280_s2, %s35_s22 }
  0x11   : > { %v37_v0 = vld [vmem:[%s36_s26] sm:$0x1]  ;;  %s46_s29 = scalar_lea.vmem %s280_s2, %s45_s24  ;;  %v56_v9 = vmax.f32 (%p23_p0), %v54_v5, %v55_v7  ;;  %v63_v10 = vmax.f32 (%p23_p0), %v61_v6, %v62_v8  ;;  %s128_s2 = sshll.u32 (%p23_p0), %s229_s1, 4  ;;  %s129_s2 = int_to_ptr.vmem [resolvable:$true] %s128_s2 }
  0x12   : > { %40 = vst.msk [vmem:[%s38_s30] sm:$0x1] %vm39_vm0, %v37_v0  ;;  %v47_v1 = vld [vmem:[%s46_s29] sm:$0x1] }
  0x13   : > { %154 = vst.msk [vmem:[%s38_s30 + $0x8] sm:$0x1] %vm39_vm0, %v47_v1  ;;  %v57_v11 = vrot.slane (%p23_p0), %v56_v9, 2  ;;  %v64_v12 = vrot.slane (%p23_p0), %v63_v10, 2 }
  0x15   :  { %v58_v13 = vmax.f32 %v56_v9, %v57_v11  ;;  %v65_v14 = vmax.f32 %v63_v10, %v64_v12 }
  0x17   :  { %v59_v15 = vrot.slane %v58_v13, 1  ;;  %v66_v16 = vrot.slane %v65_v14, 1 }
  0x19   :  { %v60_v17 = vmax.f32 %v58_v13, %v59_v15  ;;  %v67_v18 = vmax.f32 %v65_v14, %v66_v16 }
  0x1a   :  { %v92_v43 = vld [vmem:[#allocation2] sm:$0xff]  ;;  %v93_v49 = vld [vmem:[#allocation2 + $0x8] sm:$0xff] }
  0x1b   :  { %v68_v19 = vsub.f32 %v51_v2, %v60_v17  ;;  %v69_v20 = vsub.f32 %v52_v3, %v67_v18 }
  0x1d   :  { %v70_v21 = vmul.f32 1.442695, %v68_v19  ;;  %v72_v22 = vmul.f32 1.442695, %v69_v20 }
  0x1f   :  { %171 = vpow2.f32 %v70_v21 }
  0x20   :  { %173 = vpow2.f32 %v72_v22 }
  0x25   :  { %v172_v23 = vpop.eup %171 }
  0x26   :  { %v174_v24 = vpop.eup %173  ;;  %v74_v25 = vsel %vm53_vm1, %v172_v23, 0.0 }
  0x27   :  { %v75_v26 = vrot.slane %v74_v25, 4  ;;  %v81_v27 = vsel %vm53_vm1, %v174_v24, 0.0 }
  0x28   :  { %v82_v28 = vrot.slane %v81_v27, 4 }
  0x29   :  { %v76_v29 = vadd.f32 %v75_v26, %v74_v25 }
  0x2a   :  { %v83_v30 = vadd.f32 %v82_v28, %v81_v27 }
  0x2b   :  { %v77_v31 = vrot.slane %v76_v29, 2 }
  0x2c   :  { %v84_v32 = vrot.slane %v83_v30, 2 }
  0x2d   :  { %v78_v33 = vadd.f32 %v77_v31, %v76_v29 }
  0x2e   :  { %v85_v34 = vadd.f32 %v84_v32, %v83_v30 }
  0x2f   :  { %v79_v35 = vrot.slane %v78_v33, 1 }
  0x30   :  { %v86_v36 = vrot.slane %v85_v34, 1 }
  0x31   :  { %v80_v37 = vadd.f32 %v79_v35, %v78_v33 }
  0x32   :  { %v87_v38 = vadd.f32 %v86_v36, %v85_v34 }
  0x33   :  { %175 = vrcp.f32 %v80_v37 }
  0x34   :  { %177 = vrcp.f32 %v87_v38 }
  0x39   :  { %v176_v39 = vpop.eup %175 }
  0x3a   :  { %v90_v40 = vmul.f32 %v176_v39, %v172_v23  ;;  %v178_v41 = vpop.eup %177 }
  0x3b   :  { %v91_v42 = vmul.f32 %v178_v41, %v174_v24 }
  0x3c   :  { %96 = vperm.xlu0 %170, %v90_v40  }
  0x44   :  { %101 = vperm.xlu0 %170, %v91_v42  }
  0xae   :  { %v97_v44 = vpop.permute.xlu0 %96 }
  0xaf   :  { %v104_v45 = vmul.f32 %v97_v44, %v92_v43 }
  0xb1   :  { %v107_v46 = vsel %vm106_vm2, %v104_v45, 0.0 }
  0xb2   :  { %v108_v47 = vrot.slane %v107_v46, 4 }
  0xb4   :  { %v109_v48 = vadd.f32 %v108_v47, %v107_v46 }
  0xb6   :  { %v110_v50 = vrot.slane %v109_v48, 2  ;;  %v102_v51 = vpop.permute.xlu0 %101 }
  0xb7   :  { %v105_v52 = vmul.f32 %v102_v51, %v93_v49 }
  0xb8   :  { %v111_v53 = vadd.f32 %v110_v50, %v109_v48 }
  0xb9   :  { %v114_v54 = vsel %vm106_vm2, %v105_v52, 0.0 }
  0xba   :  { %v112_v55 = vrot.slane %v111_v53, 1  ;;  %v115_v56 = vrot.slane %v114_v54, 4 }
  0xbc   :  { %v113_v57 = vadd.f32 %v112_v55, %v111_v53  ;;  %v116_v58 = vadd.f32 %v115_v56, %v114_v54 }
  0xbe   :  { %122 = vst.msk [vmem:[#allocation5] sm:$0x1] %vm39_vm0, %v113_v57  ;;  %v117_v59 = vrot.slane %v116_v58, 2 }
  0xc0   :  { %v118_v60 = vadd.f32 %v117_v59, %v116_v58 }
  0xc2   :  { %v119_v61 = vrot.slane %v118_v60, 1 }
  0xc4   :  { %v120_v62 = vadd.f32 %v119_v61, %v118_v60 }
  0xc6   :  { %123 = vst.msk [vmem:[#allocation5 + $0x1] sm:$0x1] %vm39_vm0, %v120_v62 }
  0xc7   :  { %136 = dma.vmem_to_hbm [thread:$0]  %s129_s2, 32, %s131_s10, [#allocation6], %s230_s11, %s230_s11, %s231_s12  }
  0xc8   :  { %221 = dma.done.wait [#allocation6], 32  }
  0xc9   :  { %222 = vsyncadd [#allocation6], 4294967264 }
  0xca   :  { %141 = vsyncpa [#allocation6], 1 }

</bundles_post_ra>
